<compile_context>
chip_gen: v7x
topology: tpu7x:2x2x1
jax: 0.10.0
libtpu: 0.0.40
codegen_flags: <defaults>
</compile_context>

<pallas_src>
import functools

import jax
import jax.numpy as jnp
from jax.experimental import pallas as pl
from jax.experimental.pallas import tpu as pltpu


def _erf_approx(z):
    # Abramowitz & Stegun 7.1.26, max abs error ~1.5e-7, odd-symmetric.
    a1, a2, a3, a4, a5 = (0.254829592, -0.284496736, 1.421413741,
                          -1.453152027, 1.061405429)
    p = 0.3275911
    az = jnp.abs(z)
    t = 1.0 / (1.0 + p * az)
    poly = ((((a5 * t + a4) * t + a3) * t + a2) * t + a1) * t
    y = 1.0 - poly * jnp.exp(-az * az)
    return jnp.where(z >= 0, y, -y)


def _gelu_exact(v):
    # nn.GELU() default: 0.5 * v * (1 + erf(v / sqrt(2)))
    return 0.5 * v * (1.0 + _erf_approx(v * 0.7071067811865476))


def dca_kernel(x_ref, m1_ref, b1_ref, m2_ref, b2_ref, o_ref, acc_ref, *,
               ragged, valid_last):
    # x_ref  : (1, C, St)   input spatial tile (original dtype), spatial on lanes
    # m1_ref : (midp, C)    folded (1/HW + Conv1d_rd + concat + 3x3 centre tap) matrix
    # b1_ref : (midp, 1)    folded bias
    # m2_ref : (C, midp)    1x1 conv weight
    # b2_ref : (C, 1)       1x1 conv bias
    # o_ref  : (1, C, 1)    output (channel attention weights)
    # acc_ref: (C, 1) f32   running channel sums (global average pool accumulator)
    s = pl.program_id(1)
    last = pl.num_programs(1) - 1

    @pl.when(s == 0)
    def _init():
        acc_ref[...] = jnp.zeros_like(acc_ref)

    def _accumulate(mask_lanes):
        tile = x_ref[0].astype(jnp.float32)                     # (C, St)
        if mask_lanes:
            lane = jax.lax.broadcasted_iota(jnp.int32, tile.shape, 1)
            tile = jnp.where(lane < valid_last, tile, 0.0)
        # keepdims keeps the partial sum sublane-major: no per-step relayout.
        acc_ref[...] += jnp.sum(tile, axis=-1, keepdims=True)   # (C, 1)

    if ragged:
        @pl.when(s != last)
        def _full_tile():
            _accumulate(False)

        @pl.when(s == last)
        def _masked_tile():
            _accumulate(True)
    else:
        _accumulate(False)

    @pl.when(s == last)
    def _finish():
        pooled = acc_ref[...]                                   # (C, 1); 1/HW folded into m1
        h = jnp.dot(m1_ref[...], pooled,
                    preferred_element_type=jnp.float32) + b1_ref[...]    # (midp, 1)
        h = _gelu_exact(h)
        out = jnp.dot(m2_ref[...], h,
                      preferred_element_type=jnp.float32) + b2_ref[...]  # (C, 1)
        o_ref[0] = jax.nn.sigmoid(out).astype(o_ref.dtype)


def dca_forward(x, w1d, b1d, w_mlp1, b_mlp1, w_mlp2, b_mlp2, theta=1.0,
                tile_budget_bytes=None):
    """x: (N, C, H, W); returns (N, C, 1, 1) like DCA.forward."""
    N, C, H, W = x.shape
    mid = w_mlp1.shape[0]
    f32 = jnp.float32
    S = H * W
    inv_s = 1.0 / float(S)

    # ---- host-side weight-only folding (exact algebra, O(C*mid) work) ----
    # Conv1d_rd theta-reweighted taps (theta != 0 branch of the module).
    w = w1d.reshape(5).astype(f32)
    wr = jnp.stack([w[0] - theta * w[1],
                    w[1] - theta * w[2],
                    w[2] * (1.0 - theta),
                    w[3] - theta * w[2],
                    w[4] - theta * w[3]])
    # Banded Toeplitz T with T[i, j] = wr[i - j + 2]  =>  x1 = T.T @ p  (column view).
    d = jnp.arange(C)[:, None] - jnp.arange(C)[None, :] + 2
    T = jnp.where((d >= 0) & (d <= 4), wr[jnp.clip(d, 0, 4)], 0.0)          # (C, C)

    # 3x3 conv with padding=1 applied to a 1x1 map only sees its centre tap.
    Wc = w_mlp1[:, :, 1, 1].astype(f32)                                     # (mid, 2C)
    Wa, Wb = Wc[:, :C], Wc[:, C:]
    M1 = (Wa + Wb @ T.T) * inv_s                                            # (mid, C); pool scale folded
    B1 = b_mlp1.astype(f32) + b1d.astype(f32)[0] * jnp.sum(Wb, axis=1)      # (mid,)
    M2 = w_mlp2[:, :, 0, 0].astype(f32)                                     # (C, mid)

    # Pad mid to a multiple of 128 (lane-aligned epilogue; zeros are exact no-ops).
    midp = ((mid + 127) // 128) * 128
    M1p = jnp.zeros((midp, C), f32).at[:mid].set(M1)
    B1p = jnp.zeros((midp, 1), f32).at[:mid, 0].set(B1)
    M2p = jnp.zeros((C, midp), f32).at[:, :mid].set(M2)
    B2p = b_mlp2.astype(f32).reshape(C, 1)

    # ---- generation-aware tiling: lane-dense reduction axis, VMEM-bounded ----
    itemsize = jnp.dtype(x.dtype).itemsize
    try:
        vmem_cap = int(pltpu.get_tpu_info().vmem_capacity_bytes)
    except Exception:
        vmem_cap = 64 * 2**20                       # conservative (v7x per-TensorCore)
    vmem_budget = (vmem_cap * 3) // 4               # ~75% of physical VMEM

    weight_bytes = 4 * (2 * midp * C + midp + 2 * C)
    headroom = 2 * 2**20 + 2 * weight_bytes
    tile_budget = min(16 * 2**20, max(1 * 2**20, (vmem_budget - headroom) // 2))
    if tile_budget_bytes is not None:               # test hook to force tiling/ragged paths
        tile_budget = int(tile_budget_bytes)
    max_elems = max(128, tile_budget // max(1, C * itemsize))

    if S <= max_elems:
        St = S
    else:
        St = max(128, (max_elems // 128) * 128)     # multiple of 128 lanes
    n_tiles = pl.cdiv(S, St)
    valid_last = S - (n_tiles - 1) * St
    ragged = valid_last != St                       # ragged last tile masked in-kernel

    x3 = x.reshape(N, C, S)                         # no host-side padding of the big tensor

    c_pad = ((C + 7) // 8) * 8
    st_pad = ((St + 127) // 128) * 128
    x_block_bytes = c_pad * st_pad * itemsize
    vmem_limit = int(min(vmem_budget,
                         max(8 * 2**20, 2 * x_block_bytes + 2 * weight_bytes + 4 * 2**20)))

    cost = pl.CostEstimate(
        flops=int(N * C * S + 4 * N * C * midp),
        transcendentals=int(N * (midp + C)),
        bytes_accessed=int(N * C * S * itemsize + weight_bytes + N * C * itemsize))

    kernel = functools.partial(dca_kernel, ragged=bool(ragged),
                               valid_last=int(valid_last))

    # TODO(synk): on v7x with N < 2, split the spatial tiles over a second "parallel"
    # grid axis (one per TensorCore) with per-core partial sums combined afterwards.
    out3 = pl.pallas_call(
        kernel,
        out_shape=jax.ShapeDtypeStruct((N, C, 1), x.dtype),
        grid_spec=pltpu.PrefetchScalarGridSpec(
            num_scalar_prefetch=0,
            grid=(N, n_tiles),
            in_specs=[
                pl.BlockSpec((1, C, St), lambda n, s: (n, 0, s)),   # x tile
                pl.BlockSpec((midp, C), lambda n, s: (0, 0)),       # M1 (folded)
                pl.BlockSpec((midp, 1), lambda n, s: (0, 0)),       # B1 (folded)
                pl.BlockSpec((C, midp), lambda n, s: (0, 0)),       # M2
                pl.BlockSpec((C, 1), lambda n, s: (0, 0)),          # B2
            ],
            out_specs=pl.BlockSpec((1, C, 1), lambda n, s: (n, 0, 0)),
            scratch_shapes=[pltpu.VMEM((C, 1), jnp.float32)],
        ),
        compiler_params=pltpu.CompilerParams(
            dimension_semantics=("parallel", "arbitrary"),
            vmem_limit_bytes=vmem_limit),
        cost_estimate=cost,
    )(x3, M1p, B1p, M2p, B2p)

    return out3.reshape(N, C, 1, 1)


def dca_reference(x, w1d, b1d, w_mlp1, b_mlp1, w_mlp2, b_mlp2, theta=1.0):
    """Pure-JAX reference that mirrors the PyTorch module step by step."""
    N, C, H, W = x.shape
    p = jnp.mean(x.astype(jnp.float32), axis=(2, 3))             # (N, C)

    # Conv1d_rd (theta != 0 branch): reweighted 5-tap conv over channels, pad=2.
    w = w1d.reshape(5).astype(jnp.float32)
    wr = jnp.stack([w[0] - theta * w[1],
                    w[1] - theta * w[2],
                    w[2] * (1.0 - theta),
                    w[3] - theta * w[2],
                    w[4] - theta * w[3]])
    ppad = jnp.pad(p, ((0, 0), (2, 2)))
    x1 = sum(wr[k] * ppad[:, k:k + C] for k in range(5)) + b1d.astype(jnp.float32)[0]

    x2 = jnp.concatenate([p, x1], axis=1).reshape(N, 2 * C, 1, 1)
    h = jax.lax.conv_general_dilated(
        x2, w_mlp1.astype(jnp.float32), (1, 1), ((1, 1), (1, 1)),
        dimension_numbers=("NCHW", "OIHW", "NCHW")) + b_mlp1.reshape(1, -1, 1, 1)
    h = jax.nn.gelu(h, approximate=False)
    out = jax.lax.conv_general_dilated(
        h, w_mlp2.astype(jnp.float32), (1, 1), ((0, 0), (0, 0)),
        dimension_numbers=("NCHW", "OIHW", "NCHW")) + b_mlp2.reshape(1, -1, 1, 1)
    return jax.nn.sigmoid(out).astype(x.dtype)


if __name__ == "__main__":
    key = jax.random.PRNGKey(0)
    keys = jax.random.split(key, 8)

    # inc must be >= ratio (=8) so the MLP bottleneck has >= 1 channel.
    N, C, H, W = 2, 32, 16, 16
    ratio = 8
    mid = C // ratio
    theta = 1.0

    x = jax.random.normal(keys[0], (N, C, H, W), dtype=jnp.float32)
    w1d = jax.random.normal(keys[1], (1, 1, 5), dtype=jnp.float32) * 0.3     # Conv1d_rd weight
    b1d = jax.random.normal(keys[2], (1,), dtype=jnp.float32) * 0.1          # Conv1d_rd bias
    w_mlp1 = jax.random.normal(keys[3], (mid, 2 * C, 3, 3), dtype=jnp.float32) * 0.1
    b_mlp1 = jax.random.normal(keys[4], (mid,), dtype=jnp.float32) * 0.1
    w_mlp2 = jax.random.normal(keys[5], (C, mid, 1, 1), dtype=jnp.float32) * 0.3
    b_mlp2 = jax.random.normal(keys[6], (C,), dtype=jnp.float32) * 0.1

    # 1) Single-tile path (S fits in one lane-dense block).
    out = jax.block_until_ready(
        dca_forward(x, w1d, b1d, w_mlp1, b_mlp1, w_mlp2, b_mlp2, theta=theta))
    ref = dca_reference(x, w1d, b1d, w_mlp1, b_mlp1, w_mlp2, b_mlp2, theta=theta)
    assert out.shape == (N, C, 1, 1)
    assert jnp.allclose(out, ref, atol=1e-4, rtol=1e-4), \
        float(jnp.max(jnp.abs(out - ref)))

    # 2) Multi-tile path with a ragged (in-kernel masked) last tile:
    #    S = 400, forced St = 128 -> 4 tiles, last tile has 16 valid lanes.
    x2 = jax.random.normal(keys[7], (N, C, 20, 20), dtype=jnp.float32)
    out2 = jax.block_until_ready(
        dca_forward(x2, w1d, b1d, w_mlp1, b_mlp1, w_mlp2, b_mlp2, theta=theta,
                    tile_budget_bytes=C * 128 * 4))
    ref2 = dca_reference(x2, w1d, b1d, w_mlp1, b_mlp1, w_mlp2, b_mlp2, theta=theta)
    assert out2.shape == (N, C, 1, 1)
    assert jnp.allclose(out2, ref2, atol=1e-4, rtol=1e-4), \
        float(jnp.max(jnp.abs(out2 - ref2)))

    print("KERNEL_OK")
</pallas_src>

<mosaic_0001>
module attributes {stable_mosaic.version = 11 : i64} {
  func.func @dca_kernel(%arg0: i32, %arg1: i32, %arg2: memref<1x32x256xf32, #tpu.memory_space<vmem>>, %arg3: memref<128x32xf32, #tpu.memory_space<vmem>>, %arg4: memref<128x1xf32, #tpu.memory_space<vmem>>, %arg5: memref<32x128xf32, #tpu.memory_space<vmem>>, %arg6: memref<32x1xf32, #tpu.memory_space<vmem>>, %arg7: memref<1x32x1xf32, #tpu.memory_space<vmem>>, %arg8: memref<32x1xf32, #tpu.memory_space<vmem>>) attributes {dimension_semantics = [#tpu.dimension_semantics<parallel>, #tpu.dimension_semantics<arbitrary>], iteration_bounds = array<i64: 2, 1>, scalar_prefetch = 0 : i64, scratch_operands = 1 : i64, tpu.core_type = #tpu.core_type<tc>, window_params = [{transform_indices = @transform_0, window_bounds = array<i64: 1, 32, 256>}, {pipeline_mode = #tpu.pipeline_mode<synchronous>, transform_indices = @transform_1, window_bounds = array<i64: 128, 32>}, {pipeline_mode = #tpu.pipeline_mode<synchronous>, transform_indices = @transform_2, window_bounds = array<i64: 128, 1>}, {pipeline_mode = #tpu.pipeline_mode<synchronous>, transform_indices = @transform_3, window_bounds = array<i64: 32, 128>}, {pipeline_mode = #tpu.pipeline_mode<synchronous>, transform_indices = @transform_4, window_bounds = array<i64: 32, 1>}, {transform_indices = @transform_5, window_bounds = array<i64: 1, 32, 1>}]} {
    %c0_i32 = arith.constant 0 : i32
    %0 = arith.cmpi eq, %arg1, %c0_i32 : i32
    %1 = arith.extui %0 : i1 to i32
    %c0_i32_0 = arith.constant 0 : i32
    %2 = arith.cmpi ne, %1, %c0_i32_0 : i32
    scf.if %2 {
      %cst_9 = arith.constant 0.000000e+00 : f32
      %13 = vector.broadcast %cst_9 : f32 to vector<32x1xf32>
      %c0_10 = arith.constant 0 : index
      %c0_11 = arith.constant 0 : index
      %14 = vector.load %arg8[%c0_10, %c0_11] : memref<32x1xf32, #tpu.memory_space<vmem>>, vector<32x1xf32>
      tpu.vector_store %arg8[%c0_10, %c0_11], %13 {strides = array<i32>} : memref<32x1xf32, #tpu.memory_space<vmem>>, vector<32x1xf32>,
    } else {
    }
    %c0 = arith.constant 0 : index
    %c0_1 = arith.constant 0 : index
    %c0_2 = arith.constant 0 : index
    %3 = vector.load %arg2[%c0, %c0_1, %c0_2] : memref<1x32x256xf32, #tpu.memory_space<vmem>>, vector<1x32x256xf32>
    %4 = vector.shape_cast %3 : vector<1x32x256xf32> to vector<32x256xf32>
    %c0_3 = arith.constant 0 : index
    %c0_4 = arith.constant 0 : index
    %5 = vector.load %arg8[%c0_3, %c0_4] : memref<32x1xf32, #tpu.memory_space<vmem>>, vector<32x1xf32>
    %cst = arith.constant dense<0.000000e+00> : vector<32xf32>
    %6 = vector.multi_reduction <add>, %4, %cst [1] : vector<32x256xf32> to vector<32xf32>
    %7 = vector.shape_cast %6 : vector<32xf32> to vector<32x1xf32>
    %8 = arith.addf %5, %7 : vector<32x1xf32>
    %c0_5 = arith.constant 0 : index
    %c0_6 = arith.constant 0 : index
    %9 = vector.load %arg8[%c0_5, %c0_6] : memref<32x1xf32, #tpu.memory_space<vmem>>, vector<32x1xf32>
    tpu.vector_store %arg8[%c0_5, %c0_6], %8 {strides = array<i32>} : memref<32x1xf32, #tpu.memory_space<vmem>>, vector<32x1xf32>,
    %c0_i32_7 = arith.constant 0 : i32
    %10 = arith.cmpi eq, %arg1, %c0_i32_7 : i32
    %11 = arith.extui %10 : i1 to i32
    %c0_i32_8 = arith.constant 0 : i32
    %12 = arith.cmpi ne, %11, %c0_i32_8 : i32
    scf.if %12 {
      %c0_9 = arith.constant 0 : index
      %c0_10 = arith.constant 0 : index
      %13 = vector.load %arg8[%c0_9, %c0_10] : memref<32x1xf32, #tpu.memory_space<vmem>>, vector<32x1xf32>
      %c0_11 = arith.constant 0 : index
      %c0_12 = arith.constant 0 : index
      %14 = vector.load %arg3[%c0_11, %c0_12] : memref<128x32xf32, #tpu.memory_space<vmem>>, vector<128x32xf32>
      %cst_13 = arith.constant dense<0.000000e+00> : vector<128x1xf32>
      %15 = tpu.matmul %14, %13, %cst_13 {dimension_numbers = #tpu.dot_dimension_numbers<[1], [0], [0], [1], [0, 0, 1, 1], [], []>} : vector<128x32xf32>, vector<32x1xf32>, vector<128x1xf32> -> vector<128x1xf32>
      %c0_14 = arith.constant 0 : index
      %c0_15 = arith.constant 0 : index
      %16 = vector.load %arg4[%c0_14, %c0_15] : memref<128x1xf32, #tpu.memory_space<vmem>>, vector<128x1xf32>
      %17 = arith.addf %15, %16 : vector<128x1xf32>
      %cst_16 = arith.constant 5.000000e-01 : f32
      %18 = vector.broadcast %cst_16 : f32 to vector<128x1xf32>
      %19 = arith.mulf %18, %17 : vector<128x1xf32>
      %cst_17 = arith.constant 0.707106769 : f32
      %20 = vector.broadcast %cst_17 : f32 to vector<128x1xf32>
      %21 = arith.mulf %17, %20 : vector<128x1xf32>
      %22 = math.absf %21 : vector<128x1xf32>
      %cst_18 = arith.constant 0.327591091 : f32
      %23 = vector.broadcast %cst_18 : f32 to vector<128x1xf32>
      %24 = arith.mulf %23, %22 : vector<128x1xf32>
      %cst_19 = arith.constant 1.000000e+00 : f32
      %25 = vector.broadcast %cst_19 : f32 to vector<128x1xf32>
      %26 = arith.addf %25, %24 : vector<128x1xf32>
      %cst_20 = arith.constant 1.000000e+00 : f32
      %27 = vector.broadcast %cst_20 : f32 to vector<128x1xf32>
      %28 = arith.divf %27, %26 : vector<128x1xf32>
      %cst_21 = arith.constant 1.06140542 : f32
      %29 = vector.broadcast %cst_21 : f32 to vector<128x1xf32>
      %30 = arith.mulf %29, %28 : vector<128x1xf32>
      %cst_22 = arith.constant -1.45315206 : f32
      %31 = vector.broadcast %cst_22 : f32 to vector<128x1xf32>
      %32 = arith.addf %30, %31 : vector<128x1xf32>
      %33 = arith.mulf %32, %28 : vector<128x1xf32>
      %cst_23 = arith.constant 1.42141378 : f32
      %34 = vector.broadcast %cst_23 : f32 to vector<128x1xf32>
      %35 = arith.addf %33, %34 : vector<128x1xf32>
      %36 = arith.mulf %35, %28 : vector<128x1xf32>
      %cst_24 = arith.constant -0.284496725 : f32
      %37 = vector.broadcast %cst_24 : f32 to vector<128x1xf32>
      %38 = arith.addf %36, %37 : vector<128x1xf32>
      %39 = arith.mulf %38, %28 : vector<128x1xf32>
      %cst_25 = arith.constant 0.254829586 : f32
      %40 = vector.broadcast %cst_25 : f32 to vector<128x1xf32>
      %41 = arith.addf %39, %40 : vector<128x1xf32>
      %42 = arith.mulf %41, %28 : vector<128x1xf32>
      %cst_26 = arith.constant 0.000000e+00 : f32
      %43 = vector.broadcast %cst_26 : f32 to vector<128x1xf32>
      %44 = arith.subf %43, %22 : vector<128x1xf32>
      %45 = arith.mulf %44, %22 : vector<128x1xf32>
      %46 = math.exp %45 : vector<128x1xf32>
      %47 = arith.mulf %42, %46 : vector<128x1xf32>
      %cst_27 = arith.constant 1.000000e+00 : f32
      %48 = vector.broadcast %cst_27 : f32 to vector<128x1xf32>
      %49 = arith.subf %48, %47 : vector<128x1xf32>
      %cst_28 = arith.constant 0.000000e+00 : f32
      %50 = vector.broadcast %cst_28 : f32 to vector<128x1xf32>
      %51 = arith.cmpf oge, %21, %50 : vector<128x1xf32>
      %cst_29 = arith.constant 0.000000e+00 : f32
      %52 = vector.broadcast %cst_29 : f32 to vector<128x1xf32>
      %53 = arith.subf %52, %49 : vector<128x1xf32>
      %54 = arith.select %51, %49, %53 : vector<128x1xi1>, vector<128x1xf32>
      %cst_30 = arith.constant 1.000000e+00 : f32
      %55 = vector.broadcast %cst_30 : f32 to vector<128x1xf32>
      %56 = arith.addf %55, %54 : vector<128x1xf32>
      %57 = arith.mulf %19, %56 : vector<128x1xf32>
      %c0_31 = arith.constant 0 : index
      %c0_32 = arith.constant 0 : index
      %58 = vector.load %arg5[%c0_31, %c0_32] : memref<32x128xf32, #tpu.memory_space<vmem>>, vector<32x128xf32>
      %cst_33 = arith.constant dense<0.000000e+00> : vector<32x1xf32>
      %59 = tpu.matmul %58, %57, %cst_33 {dimension_numbers = #tpu.dot_dimension_numbers<[1], [0], [0], [1], [0, 0, 1, 1], [], []>} : vector<32x128xf32>, vector<128x1xf32>, vector<32x1xf32> -> vector<32x1xf32>
      %c0_34 = arith.constant 0 : index
      %c0_35 = arith.constant 0 : index
      %60 = vector.load %arg6[%c0_34, %c0_35] : memref<32x1xf32, #tpu.memory_space<vmem>>, vector<32x1xf32>
      %61 = arith.addf %59, %60 : vector<32x1xf32>
      %62 = arith.negf %61 : vector<32x1xf32>
      %63 = math.exp %62 : vector<32x1xf32>
      %cst_36 = arith.constant 1.000000e+00 : f32
      %64 = vector.broadcast %cst_36 : f32 to vector<32x1xf32>
      %65 = arith.addf %64, %63 : vector<32x1xf32>
      %66 = arith.divf %64, %65 : vector<32x1xf32>
      %c0_37 = arith.constant 0 : index
      %c0_38 = arith.constant 0 : index
      %c0_39 = arith.constant 0 : index
      %67 = vector.load %arg7[%c0_37, %c0_38, %c0_39] : memref<1x32x1xf32, #tpu.memory_space<vmem>>, vector<1x32x1xf32>
      %68 = vector.shape_cast %67 : vector<1x32x1xf32> to vector<32x1xf32>
      %69 = vector.shape_cast %66 : vector<32x1xf32> to vector<1x32x1xf32>
      tpu.vector_store %arg7[%c0_37, %c0_38, %c0_39], %69 {strides = array<i32>} : memref<1x32x1xf32, #tpu.memory_space<vmem>>, vector<1x32x1xf32>,
    } else {
    }
    return
  }
  func.func @transform_0(%arg0: i32, %arg1: i32) -> (i32, i32, i32) {
    %c0_i32 = arith.constant 0 : i32
    %c0_i32_0 = arith.constant 0 : i32
    return %arg0, %c0_i32, %arg1 : i32, i32, i32
  }
  func.func @transform_1(%arg0: i32, %arg1: i32) -> (i32, i32) {
    %c0_i32 = arith.constant 0 : i32
    %c0_i32_0 = arith.constant 0 : i32
    %c0_i32_1 = arith.constant 0 : i32
    return %c0_i32, %c0_i32_0 : i32, i32
  }
  func.func @transform_2(%arg0: i32, %arg1: i32) -> (i32, i32) {
    %c0_i32 = arith.constant 0 : i32
    %c0_i32_0 = arith.constant 0 : i32
    %c0_i32_1 = arith.constant 0 : i32
    return %c0_i32, %c0_i32_0 : i32, i32
  }
  func.func @transform_3(%arg0: i32, %arg1: i32) -> (i32, i32) {
    %c0_i32 = arith.constant 0 : i32
    %c0_i32_0 = arith.constant 0 : i32
    %c0_i32_1 = arith.constant 0 : i32
    return %c0_i32, %c0_i32_0 : i32, i32
  }
  func.func @transform_4(%arg0: i32, %arg1: i32) -> (i32, i32) {
    %c0_i32 = arith.constant 0 : i32
    %c0_i32_0 = arith.constant 0 : i32
    %c0_i32_1 = arith.constant 0 : i32
    return %c0_i32, %c0_i32_0 : i32, i32
  }
  func.func @transform_5(%arg0: i32, %arg1: i32) -> (i32, i32, i32) {
    %c0_i32 = arith.constant 0 : i32
    %c0_i32_0 = arith.constant 0 : i32
    %c0_i32_1 = arith.constant 0 : i32
    return %arg0, %c0_i32, %c0_i32_0 : i32, i32, i32
  }
}

</mosaic_0001>

<bundles_post_ra>
// kernel: tpu_custom_call.1
= control target key start
LH: loop header
LB: loop body
LE: loop exit
PB: predicated region body
PF: predicated region fallthrough
CT: control target
= control target key end

     0   :  { %s1493_s18 = smov 0   ;;  %s1495_s19 = smov 0   ;;  %s2045_s0 = inlined_call_operand.vmem [shape: f32[2,32,256], index: 0, kind: input, shape index: {}]   ;;  %s2046_s1 = inlined_call_operand.vmem [shape: f32[128,32], index: 1, kind: input, shape index: {}]   ;;  %s2047_s2 = inlined_call_operand.vmem [shape: f32[128,1], index: 2, kind: input, shape index: {}]   ;;  %s2048_s3 = inlined_call_operand.vmem [shape: f32[32,128], index: 3, kind: input, shape index: {}]   ;;  %s2049_s4 = inlined_call_operand.vmem [shape: f32[32,1], index: 4, kind: input, shape index: {}]   ;;  %s2050_s5 = inlined_call_operand.vmem [shape: f32[2,32,1], index: 5, kind: output, shape index: {}]  }
   0x1   :  { %s1497_s20 = smov 0  }
   0x2 LB: > { %s27_s21 = sadd.s32 1, %s1456_s19  ;;  %p1154_p0 = scmp.ge.s32.totalorder %s1460_s20, 1  ;;  %s1460_s20 = sphi %s1497_s20, %s15_s20   ;;  %s1456_s19 = sphi %s1495_s19, %s2052_s19   ;;  %s1452_s18 = sphi %s1493_s18, %s2051_s18  }
   0x3   : > { %p29_p1 = scmp.ge.s32.totalorder %s27_s21, 2  ;;  %p206_p2 = scmp.lt.s32.totalorder %s1460_s20, 3 }
   0x5   : > { %s2054_s21 = smov (%p29_p1, %s27_s21), 0  ;;  %p207_p3 = pnand %p1154_p0, %p206_p2 }
   0x6   : > { %p239_p4 = scmp.lt.s32.totalorder (!%p207_p3), %s1452_s18, 1  ;;  %vm257_vm0 = vcmask (!%p207_p3), 7168   ;;  %v1462_v0 = vmov (!%p207_p3), 0.0   ;;  %v302_v13 = vld [vmem:[%s2046_s1] sm:$0xff] (!%p207_p3)  ;;  %vm334_vm1 = vcmask (!%p207_p3), 261120   ;;  %v303_v32 = vld [vmem:[%s2046_s1 + $0x8] sm:$0xff] (!%p207_p3) }
   0x7   : > { %210 = sbr.rel (%p207_p3) target bundleno = 788 (0x314), region = 40  ;;  %260 = vst.msk [vmem:[#allocation2 + $0x10] sm:$0xff] (!%p207_p3), %vm257_vm0, %v1462_v0  ;;  %258 = vst.msk [vmem:[#allocation2] sm:$0xff] (!%p207_p3), %vm257_vm0, %v1462_v0  ;;  %1231 = vmatprep.mubr.msk.f32.mxu0 (!%p207_p3), %vm334_vm1, %v302_v13  ;;  %v304_v33 = vld [vmem:[%s2046_s1 + $0x10] sm:$0xff] (!%p207_p3)  ;;  %v305_v34 = vld [vmem:[%s2046_s1 + $0x18] sm:$0xff] (!%p207_p3) }
   0x8   : > { %259 = vst.msk [vmem:[#allocation2 + $0x8] sm:$0xff] (!%p207_p3), %vm257_vm0, %v1462_v0  ;;  %261 = vst.msk [vmem:[#allocation2 + $0x18] sm:$0xff] (!%p207_p3), %vm257_vm0, %v1462_v0  ;;  %v306_v35 = vld [vmem:[%s2046_s1 + $0x20] sm:$0xff] (!%p207_p3)  ;;  %v307_v36 = vld [vmem:[%s2046_s1 + $0x28] sm:$0xff] (!%p207_p3) }
   0x9   : > { %v308_v37 = vld [vmem:[%s2046_s1 + $0x30] sm:$0xff] (!%p207_p3)  ;;  %v309_v38 = vld [vmem:[%s2046_s1 + $0x38] sm:$0xff] (!%p207_p3)  ;;  %v310_v39 = vld [vmem:[%s2046_s1 + $0x40] sm:$0xff] (!%p207_p3) }
   0xa   : > { %v311_v40 = vld [vmem:[%s2046_s1 + $0x48] sm:$0xff] (!%p207_p3)  ;;  %v312_v41 = vld [vmem:[%s2046_s1 + $0x50] sm:$0xff] (!%p207_p3)  ;;  %v313_v42 = vld [vmem:[%s2046_s1 + $0x58] sm:$0xff] (!%p207_p3) }
   0xb   : > { %v314_v43 = vld [vmem:[%s2046_s1 + $0x60] sm:$0xff] (!%p207_p3)  ;;  %v315_v44 = vld [vmem:[%s2046_s1 + $0x68] sm:$0xff] (!%p207_p3)  ;;  %v316_v45 = vld [vmem:[%s2046_s1 + $0x70] sm:$0xff] (!%p207_p3) }
   0xc   : > { %v317_v46 = vld [vmem:[%s2046_s1 + $0x78] sm:$0xff] (!%p207_p3)  ;;  %v319_v47 = vld [vmem:[%s2047_s2 + $0x8] sm:$0xff] (!%p207_p3)  ;;  %v318_v48 = vld [vmem:[%s2047_s2] sm:$0xff] (!%p207_p3) }
   0xd   : > { %v321_v53 = vld [vmem:[%s2047_s2 + $0x18] sm:$0xff] (!%p207_p3)  ;;  %v320_v54 = vld [vmem:[%s2047_s2 + $0x10] sm:$0xff] (!%p207_p3) }
   0xe   : > { %s2056_s18 = smov (!%p239_p4, %s1452_s18), 1  ;;  %v272_v14 = vld [vmem:[#allocation2 + $0x10] sm:$0xff]  ;;  %v270_v15 = vld [vmem:[#allocation2] sm:$0xff] }
   0xf   : > { %s1181_s22 = sshll.u32 %s2056_s18, 6  ;;  %v273_v20 = vld [vmem:[#allocation2 + $0x18] sm:$0xff]  ;;  %v271_v21 = vld [vmem:[#allocation2 + $0x8] sm:$0xff] }
  0x10   : > { %s246_s25 = scalar_lea.vmem %s2045_s0, %s1181_s22  ;;  %s1182_s22 = sshll.u32 %s2056_s18, 5 }
  0x11   : > { %v266_v1 = vld [vmem:[%s246_s25 + $0x20] sm:$0xff]  ;;  %v267_v2 = vld [vmem:[%s246_s25 + $0x28] sm:$0xff]  ;;  %v268_v6 = vld [vmem:[%s246_s25 + $0x30] sm:$0xff] }
  0x12   : > { %v262_v3 = vld [vmem:[%s246_s25] sm:$0xff]  ;;  %v280_v4 = vadd.f32 %v267_v2, %v266_v1  ;;  %v263_v5 = vld [vmem:[%s246_s25 + $0x8] sm:$0xff]  ;;  %v269_v7 = vld [vmem:[%s246_s25 + $0x38] sm:$0xff] }
  0x13   : > { %v274_v8 = vadd.f32 %v263_v5, %v262_v3  ;;  %v264_v9 = vld [vmem:[%s246_s25 + $0x10] sm:$0xff]  ;;  %v265_v10 = vld [vmem:[%s246_s25 + $0x18] sm:$0xff]  ;;  %v283_v11 = vadd.f32 %v269_v7, %v268_v6  ;;  %v322_v7 = vld [vmem:[%s2047_s2 + $0x20] sm:$0xff]  ;;  %s252_s25 = scalar_lea.vmem %s2050_s5, %s1182_s22 }
  0x14   : > { %281 = vadd.xlane.f32.xlu1 %v280_v4  ;;  %v277_v12 = vadd.f32 %v265_v10, %v264_v9  ;;  %v323_v4 = vld [vmem:[%s2047_s2 + $0x28] sm:$0xff] }
  0x15   : > { %275 = vadd.xlane.f32.xlu0 %v274_v8 }
  0x18   : > { %284 = vadd.xlane.f32.xlu1 %v283_v11 }
  0x19   : > { %278 = vadd.xlane.f32.xlu0 %v277_v12 }
  0xa1   : > { %v282_v16 = vpop.xlane.xlu1 %281 }
  0xa2   : > { %v288_v17 = vadd.f32 %v282_v16, %v272_v14  ;;  %v276_v18 = vpop.xlane.xlu0 %275 }
  0xa3   : > { %v286_v19 = vadd.f32 %v276_v18, %v270_v15  ;;  %v325_v18 = vld [vmem:[%s2047_s2 + $0x38] sm:$0xff] }
  0xa4   : > { %293 = vst.msk [vmem:[#allocation2 + $0x10] sm:$0xff] %vm257_vm0, %v288_v17 }
  0xa5   : > { %291 = vst.msk [vmem:[#allocation2] sm:$0xff] %vm257_vm0, %v286_v19  ;;  %v285_v22 = vpop.xlane.xlu1 %284 }
  0xa6   : > { %v289_v23 = vadd.f32 %v285_v22, %v273_v20  ;;  %v279_v24 = vpop.xlane.xlu0 %278  ;;  %v324_v20 = vld [vmem:[%s2047_s2 + $0x30] sm:$0xff] }
  0xa7   : > { %v287_v25 = vadd.f32 %v279_v24, %v271_v21 }
  0xa8   : > { %294 = vst.msk [vmem:[#allocation2 + $0x18] sm:$0xff] %vm257_vm0, %v289_v23 }
  0xa9   : > { %292 = vst.msk [vmem:[#allocation2 + $0x8] sm:$0xff] %vm257_vm0, %v287_v25 }
  0xab   : > { %v300_v26 = vld [vmem:[#allocation2 + $0x10] sm:$0xff] }
  0xac   : > { %v298_v27 = vld [vmem:[#allocation2] sm:$0xff] }
  0xaf   : > { %v301_v29 = vld [vmem:[#allocation2 + $0x18] sm:$0xff] }
  0xb0   : > { %v299_v28 = vld [vmem:[#allocation2 + $0x8] sm:$0xff]  ;;  %v1297_v31 = vpack.c.bf16 %v301_v29, %v300_v26 }
  0xb1   : > { %v1293_v30 = vpack.c.bf16 %v299_v28, %v298_v27  ;;  %v960_v28 = vld [vmem:[%s2048_s3] sm:$0xff] }
  0xb2   : > { %1287 = vmatprep.mubr.f32.mxu1 %v960_v28 }
  0xb3   : > { %1294 = vmatprep.subr.bf16.mxu0 %v1293_v30 }
  0xb4   : > { %1296 = vmatpush3.bf16.msra.mxu0 %v1293_v30 }
  0xb5   : > { %1298 = vmatprep.subr.bf16.mxu0 %v1297_v31 }
  0xb8   : > { %1300 = vmatpush3.bf16.msra.mxu0 %v1297_v31 }
  0xbb   : > { %1232 = vmatmul.mubr.msk.f32.vlgmr.msra.gmra.mrb[0].mxu0 %vm334_vm1, %v303_v32 }
  0xbc   : > { %1234 = vmatprep.mubr.msk.f32.mxu0 %vm334_vm1, %v304_v33 }
  0xbf   : > { %1235 = vmatmul.mubr.msk.f32.gmra.mrb[2].mxu0 %vm334_vm1, %v305_v34 }
  0xc0   : > { %1237 = vmatprep.mubr.msk.f32.mxu0 %vm334_vm1, %v306_v35 }
  0xc3   : > { %1238 = vmatmul.mubr.msk.f32.gmra.mrb[4].mxu0 %vm334_vm1, %v307_v36 }
  0xc4   : > { %1240 = vmatprep.mubr.msk.f32.mxu0 %vm334_vm1, %v308_v37 }
  0xc7   : > { %1241 = vmatmul.mubr.msk.f32.gmra.mrb[6].mxu0 %vm334_vm1, %v309_v38 }
  0xc8   : > { %1243 = vmatprep.mubr.msk.f32.mxu0 %vm334_vm1, %v310_v39 }
  0xcb   : > { %1244 = vmatmul.mubr.msk.f32.gmra.mrb[8].mxu0 %vm334_vm1, %v311_v40 }
  0xcc   : > { %1246 = vmatprep.mubr.msk.f32.mxu0 %vm334_vm1, %v312_v41 }
  0xcf   : > { %1247 = vmatmul.mubr.msk.f32.gmra.mrb[10].mxu0 %vm334_vm1, %v313_v42 }
  0xd0   : > { %1249 = vmatprep.mubr.msk.f32.mxu0 %vm334_vm1, %v314_v43  ;;  %v327_v43 = vld [vmem:[%s2047_s2 + $0x48] sm:$0xff] }
  0xd3   : > { %1250 = vmatmul.mubr.msk.f32.gmra.mrb[12].mxu0 %vm334_vm1, %v315_v44 }
  0xd4   : > { %1252 = vmatprep.mubr.msk.f32.mxu0 %vm334_vm1, %v316_v45 }
  0xd7   : > { %1253 = vmatmul.mubr.msk.f32.gmra.mrb[14].mxu0 %vm334_vm1, %v317_v46 }
 0x18e   : > { %v1233_v49 = vpop.f32.mrb[0].mxu0 }
 0x18f   : > { %v455_v50 = vadd.f32 %v1233_v49, %v319_v47  ;;  %v449_v51 = vpop.f32.mrb[1].mxu0 }
 0x190   : > { %v1595_v52 = vadd.f32 %v449_v51, %v318_v48 }
 0x191   : > { %v1603_v56 = vmul.f32 0.70710677, %v455_v50  ;;  %v1658_v36 = vmul.f32 0.5, %v455_v50 }
 0x192   : > { %v1236_v55 = vpop.f32.mrb[2].mxu0  ;;  %v1608_v59 = vmul.f32 0.70710677, %v1595_v52 }
 0x193   : > { %v1605_v57 = vadd.f32 %v1236_v55, %v321_v53  ;;  %v459_v58 = vpop.f32.mrb[3].mxu0  ;;  %v561_v63 = vand.u32 2147483647, %v1603_v56  ;;  %v1679_v53 = vmul.f32 0.5, %v1595_v52  ;;  %vm881_vm13 = vcmp.ge.f32.partialorder %v1603_v56, 0.0 }
 0x194   : > { %v1610_v60 = vadd.f32 %v459_v58, %v320_v54  ;;  %v560_v2 = vand.u32 2147483647, %v1608_v59  ;;  %vm880_vm11 = vcmp.ge.f32.partialorder %v1608_v59, 0.0 }
 0x195   : > { %v1613_v61 = vmul.f32 0.70710677, %v1605_v57  ;;  %v577_v10 = vmul.f32 0.3275911, %v561_v63  ;;  %v785_v14 = vsub.f32 0.0, %v561_v63  ;;  %v1682_v54 = vmul.f32 0.5, %v1605_v57 }
 0x196   : > { %v1616_v62 = vmul.f32 0.70710677, %v1610_v60  ;;  %v1239_v1 = vpop.f32.mrb[4].mxu0  ;;  %v576_v15 = vmul.f32 0.3275911, %v560_v2  ;;  %v784_v21 = vsub.f32 0.0, %v560_v2 }
 0x197   : > { %v563_v0 = vand.u32 2147483647, %v1613_v61  ;;  %v469_v5 = vpop.f32.mrb[5].mxu0  ;;  %v1628_v12 = vadd.f32 %v1239_v1, %v323_v4  ;;  %v593_v24 = vadd.f32 1.0, %v577_v10  ;;  %v801_v29 = vmul.f32 %v785_v14, %v561_v63 }
 0x198   : > { %v562_v3 = vand.u32 2147483647, %v1616_v62  ;;  %v1630_v17 = vadd.f32 %v469_v5, %v322_v7  ;;  %v592_v30 = vadd.f32 1.0, %v576_v15  ;;  %v800_v37 = vmul.f32 %v784_v21, %v560_v2 }
 0x199   : > { %v579_v6 = vmul.f32 0.3275911, %v563_v0  ;;  %v1636_v19 = vmul.f32 0.70710677, %v1628_v12  ;;  %v787_v33 = vsub.f32 0.0, %v563_v0  ;;  %v1697_v57 = vmul.f32 0.5, %v1610_v60 }
 0x19a   : > { %v578_v8 = vmul.f32 0.3275911, %v562_v3  ;;  %v1242_v9 = vpop.f32.mrb[6].mxu0  ;;  %v1642_v22 = vmul.f32 0.70710677, %v1630_v17  ;;  %v786_v40 = vsub.f32 0.0, %v562_v3 }
 0x19b   : > { %v595_v11 = vadd.f32 1.0, %v579_v6  ;;  %v479_v13 = vpop.f32.mrb[7].mxu0  ;;  %v565_v25 = vand.u32 2147483647, %v1636_v19  ;;  %v1645_v26 = vadd.f32 %v1242_v9, %v325_v18  ;;  %v818_v45 = vmul.f32 1.442695, %v801_v29 }
 0x19c   : > { %v594_v16 = vadd.f32 1.0, %v578_v8  ;;  %v1651_v31 = vand.u32 2147483647, %v1642_v22  ;;  %v1653_v32 = vadd.f32 %v479_v13, %v324_v20  ;;  %v803_v49 = vmul.f32 %v787_v33, %v563_v0  ;;  %v326_v8 = vld [vmem:[%s2047_s2 + $0x40] sm:$0xff] }
 0x19d   : > { %1358 = vrcp.f32 %v595_v11  ;;  %v581_v34 = vmul.f32 0.3275911, %v565_v25  ;;  %v1656_v35 = vmul.f32 0.70710677, %v1645_v26  ;;  %v789_v50 = vsub.f32 0.0, %v565_v25 }
 0x19e   : > { %1360 = vrcp.f32 %v594_v16  ;;  %v1245_v23 = vpop.f32.mrb[8].mxu0  ;;  %v580_v38 = vmul.f32 0.3275911, %v1651_v31  ;;  %v1662_v39 = vmul.f32 0.70710677, %v1653_v32  ;;  %v802_v2 = vmul.f32 %v786_v40, %v562_v3 }
 0x19f   : > { %v489_v27 = vpop.f32.mrb[9].mxu0  ;;  %1362 = vrcp.f32 %v593_v24  ;;  %v597_v41 = vadd.f32 1.0, %v581_v34  ;;  %v1665_v42 = vand.u32 2147483647, %v1656_v35  ;;  %v816_v1 = vmul.f32 1.442695, %v800_v37 }
 0x1a0   : > { %1364 = vrcp.f32 %v592_v30  ;;  %v596_v46 = vadd.f32 1.0, %v580_v38  ;;  %v1673_v47 = vand.u32 2147483647, %v1662_v39  ;;  %v1689_v4 = vadd.f32 %v1245_v23, %v327_v43 }
 0x1a1   : > { %1366 = vrcp.f32 %v597_v41  ;;  %v583_v51 = vmul.f32 0.3275911, %v1665_v42  ;;  %v822_v9 = vmul.f32 1.442695, %v803_v49  ;;  %v805_v10 = vmul.f32 %v789_v50, %v565_v25 }
 0x1a2   : > { %v1670_v44 = vpop.f32.mrb[10].mxu0  ;;  %1368 = vrcp.f32 %v596_v46  ;;  %v582_v55 = vmul.f32 0.3275911, %v1673_v47  ;;  %v788_v13 = vsub.f32 0.0, %v1651_v31  ;;  %v1705_v14 = vmul.f32 0.70710677, %v1689_v4 }
 0x1a3   : > { %v1675_v48 = vpop.f32.mrb[11].mxu0  ;;  %v599_v0 = vadd.f32 1.0, %v583_v51  ;;  %1370 = vpow2.f32 %v818_v45  ;;  %v820_v15 = vmul.f32 1.442695, %v802_v2  ;;  %v1707_v16 = vadd.f32 %v489_v27, %v326_v8 }
 0x1a4   : > { %v598_v7 = vadd.f32 1.0, %v582_v55  ;;  %v1713_v21 = vmul.f32 0.5, %v1628_v12  ;;  %v791_v23 = vsub.f32 0.0, %v1665_v42  ;;  %v1717_v24 = vand.u32 2147483647, %v1705_v14 }
 0x1a5   : > { %1372 = vrcp.f32 %v599_v0  ;;  %v826_v27 = vmul.f32 1.442695, %v805_v10  ;;  %v1725_v30 = vmul.f32 0.5, %v1630_v17  ;;  %v1728_v33 = vmul.f32 0.70710677, %v1707_v16 }
 0x1a6   : > { %v1685_v58 = vpop.f32.mrb[12].mxu0  ;;  %1374 = vrcp.f32 %v598_v7  ;;  %v804_v37 = vmul.f32 %v788_v13, %v1651_v31  ;;  %v585_v38 = vmul.f32 0.3275911, %v1717_v24  ;;  %v790_v43 = vsub.f32 0.0, %v1673_v47 }
 0x1a7   : > { %v1687_v63 = vpop.eup %1358  ;;  %v1691_v5 = vpop.f32.mrb[13].mxu0  ;;  %1376 = vpow2.f32 %v816_v1  ;;  %v1738_v17 = vand.u32 2147483647, %v1728_v33  ;;  %v807_v50 = vmul.f32 %v791_v23, %v1665_v42  ;;  %vm883_vm2 = vcmp.ge.f32.partialorder %v1613_v61, 0.0 }
 0x1a8   : > { %v1693_v6 = vpop.eup %1360  ;;  %v643_v52 = vmul.f32 1.0614054, %v1687_v63  ;;  %1378 = vpow2.f32 %v822_v9  ;;  %v601_v31 = vadd.f32 1.0, %v585_v38  ;;  %v824_v7 = vmul.f32 1.442695, %v804_v37  ;;  %v329_v37 = vld [vmem:[%s2047_s2 + $0x58] sm:$0xff] }
 0x1a9   : > { %v642_v3 = vmul.f32 1.0614054, %v1693_v6  ;;  %v1721_v28 = vpop.eup %1362  ;;  %1380 = vpow2.f32 %v820_v15  ;;  %v584_v1 = vmul.f32 0.3275911, %v1738_v17  ;;  %v806_v42 = vmul.f32 %v790_v43, %v1673_v47 }
 0x1aa   : > { %v659_v11 = vadd.f32 -1.4531521, %v643_v52  ;;  %v1709_v18 = vpop.f32.mrb[14].mxu0  ;;  %v1730_v12 = vpop.eup %1364  ;;  %1382 = vpow2.f32 %v826_v27  ;;  %v793_v47 = vsub.f32 0.0, %v1717_v24  ;;  %vm882_vm3 = vcmp.ge.f32.partialorder %v1616_v62, 0.0  ;;  %v333_v62 = vld [vmem:[%s2047_s2 + $0x78] sm:$0xff] }
 0x1ab   : > { %v658_v60 = vadd.f32 -1.4531521, %v642_v3  ;;  %v1719_v25 = vpop.f32.mrb[15].mxu0  ;;  %v1734_v40 = vpop.eup %1366  ;;  %1384 = vrcp.f32 %v601_v31  ;;  %v600_v10 = vadd.f32 1.0, %v584_v1  ;;  %vm885_vm4 = vcmp.ge.f32.partialorder %v1636_v19, 0.0 }
 0x1ac   : > { %v675_v20 = vmul.f32 %v1687_v63, %v659_v11  ;;  %v1740_v45 = vpop.eup %1368  ;;  %v645_v49 = vmul.f32 1.0614054, %v1734_v40  ;;  %vm884_vm5 = vcmp.ge.f32.partialorder %v1642_v22, 0.0  ;;  %vm887_vm6 = vcmp.ge.f32.partialorder %v1656_v35, 0.0 }
 0x1ad   : > { %v674_v29 = vmul.f32 %v1693_v6, %v658_v60  ;;  %v644_v55 = vmul.f32 1.0614054, %v1740_v45  ;;  %v1748_v2 = vpop.eup %1370  ;;  %1386 = vrcp.f32 %v600_v10  ;;  %v1774_v10 = vadd.f32 %v1670_v44, %v329_v37 }
 0x1ae   : > { %v691_v34 = vadd.f32 1.4214138, %v675_v20  ;;  %v661_v52 = vadd.f32 -1.4531521, %v645_v49  ;;  %v830_v20 = vmul.f32 1.442695, %v807_v50  ;;  %1388 = vpow2.f32 %v824_v7 }
 0x1af   : > { %v690_v41 = vadd.f32 1.4214138, %v674_v29  ;;  %v1750_v8 = vpop.eup %1372  ;;  %v660_v3 = vadd.f32 -1.4531521, %v644_v55  ;;  %vm886_vm7 = vcmp.ge.f32.partialorder %v1662_v39, 0.0  ;;  %vm889_vm8 = vcmp.ge.f32.partialorder %v1705_v14, 0.0 }
 0x1b0   : > { %v707_v46 = vmul.f32 %v1687_v63, %v691_v34  ;;  %v1753_v11 = vpop.eup %1374  ;;  %v677_v60 = vmul.f32 %v1734_v40, %v661_v52  ;;  %v647_v15 = vmul.f32 1.0614054, %v1750_v8  ;;  %1390 = vpow2.f32 %v830_v20 }
 0x1b1   : > { %v706_v51 = vmul.f32 %v1693_v6, %v690_v41  ;;  %v1758_v23 = vpop.eup %1376  ;;  %v676_v27 = vmul.f32 %v1740_v45, %v660_v3  ;;  %v646_v34 = vmul.f32 1.0614054, %v1753_v11  ;;  %vm888_vm9 = vcmp.ge.f32.partialorder %v1728_v33, 0.0 }
 0x1b2   : > { %v723_v0 = vadd.f32 -0.28449672, %v707_v46  ;;  %v693_v41 = vadd.f32 1.4214138, %v677_v60  ;;  %v663_v43 = vadd.f32 -1.4531521, %v647_v15  ;;  %v1379_v31 = vpop.eup %1378 }
 0x1b3   : > { %v722_v9 = vadd.f32 -0.28449672, %v706_v51  ;;  %v692_v49 = vadd.f32 1.4214138, %v676_v27  ;;  %v662_v50 = vadd.f32 -1.4531521, %v646_v34  ;;  %v1381_v52 = vpop.eup %1380  ;;  %v809_v34 = vmul.f32 %v793_v47, %v1717_v24 }
 0x1b4   : > { %v739_v13 = vmul.f32 %v1687_v63, %v723_v0  ;;  %v709_v55 = vmul.f32 %v1734_v40, %v693_v41  ;;  %v679_v1 = vmul.f32 %v1750_v8, %v663_v43  ;;  %v828_v0 = vmul.f32 1.442695, %v806_v42 }
 0x1b5   : > { %v738_v29 = vmul.f32 %v1693_v6, %v722_v9  ;;  %v708_v3 = vmul.f32 %v1740_v45, %v692_v49  ;;  %v792_v42 = vsub.f32 0.0, %v1738_v17  ;;  %v1789_v24 = vmul.f32 0.70710677, %v1774_v10 }
 0x1b6   : > { %v755_v38 = vadd.f32 0.2548296, %v739_v13  ;;  %v678_v13 = vmul.f32 %v1753_v11, %v662_v50  ;;  %v725_v60 = vadd.f32 -0.28449672, %v709_v55  ;;  %v695_v15 = vadd.f32 1.4214138, %v679_v1 }
 0x1b7   : > { %v754_v46 = vadd.f32 0.2548296, %v738_v29  ;;  %v724_v29 = vadd.f32 -0.28449672, %v708_v3  ;;  %1392 = vpow2.f32 %v828_v0  ;;  %v1792_v49 = vmul.f32 0.5, %v1645_v26 }
 0x1b8   : > { %v771_v51 = vmul.f32 %v1687_v63, %v755_v38  ;;  %v1383_v63 = vpop.eup %1382  ;;  %v694_v27 = vadd.f32 1.4214138, %v678_v13  ;;  %v741_v41 = vmul.f32 %v1734_v40, %v725_v60  ;;  %v711_v44 = vmul.f32 %v1750_v8, %v695_v15 }
 0x1b9   : > { %v770_v9 = vmul.f32 %v1693_v6, %v754_v46  ;;  %v1778_v38 = vpop.eup %1384  ;;  %v740_v20 = vmul.f32 %v1740_v45, %v724_v29  ;;  %v834_v55 = vmul.f32 1.442695, %v809_v34  ;;  %v808_v1 = vmul.f32 %v792_v42, %v1738_v17 }
 0x1ba   : > { %v851_v7 = vmul.f32 %v1379_v31, %v771_v51  ;;  %v710_v37 = vmul.f32 %v1753_v11, %v694_v27  ;;  %v649_v43 = vmul.f32 1.0614054, %v1778_v38  ;;  %v757_v46 = vadd.f32 0.2548296, %v741_v41  ;;  %v1795_v0 = vpop.eup %1386 }
 0x1bb   : > { %v1780_v6 = vmul.f32 %v1381_v52, %v770_v9  ;;  %v727_v50 = vadd.f32 -0.28449672, %v711_v44  ;;  %v756_v31 = vadd.f32 0.2548296, %v740_v20  ;;  %v1803_v60 = vmul.f32 0.5, %v1653_v32 }
 0x1bc   : > { %v867_v47 = vsub.f32 1.0, %v851_v7  ;;  %v726_v51 = vadd.f32 -0.28449672, %v710_v37  ;;  %v773_v9 = vmul.f32 %v1734_v40, %v757_v46  ;;  %v665_v13 = vadd.f32 -1.4531521, %v649_v43  ;;  %v1389_v7 = vpop.eup %1388 }
 0x1bd   : > { %v866_v52 = vsub.f32 1.0, %v1780_v6  ;;  %v743_v3 = vmul.f32 %v1750_v8, %v727_v50  ;;  %v772_v26 = vmul.f32 %v1740_v45, %v756_v31  ;;  %v571_v17 = vand.u32 2147483647, %v1789_v24  ;;  %v1391_v45 = vpop.eup %1390 }
 0x1be   : > { %v742_v15 = vmul.f32 %v1753_v11, %v726_v51  ;;  %v899_v29 = vsub.f32 0.0, %v867_v47  ;;  %v853_v27 = vmul.f32 %v1383_v63, %v773_v9  ;;  %v681_v42 = vmul.f32 %v1778_v38, %v665_v13 }
 0x1bf   : > { %v759_v34 = vadd.f32 0.2548296, %v743_v3  ;;  %v1809_v40 = vmul.f32 0.5, %v1689_v4  ;;  %1394 = vpow2.f32 %v834_v55  ;;  %v648_v41 = vmul.f32 1.0614054, %v1795_v0  ;;  %v328_v4 = vld [vmem:[%s2047_s2 + $0x50] sm:$0xff] }
 0x1c0   : > { %v758_v6 = vadd.f32 0.2548296, %v742_v15  ;;  %v898_v44 = vsub.f32 0.0, %v866_v52  ;;  %v697_v20 = vadd.f32 1.4214138, %v681_v42  ;;  %v852_v43 = vmul.f32 %v1389_v7, %v772_v26 }
 0x1c1   : > { %v775_v32 = vmul.f32 %v1750_v8, %v759_v34  ;;  %v832_v37 = vmul.f32 1.442695, %v808_v1  ;;  %v664_v46 = vadd.f32 -1.4531521, %v648_v41  ;;  %v587_v50 = vmul.f32 0.3275911, %v571_v17  ;;  %v1393_v31 = vpop.eup %1392 }
 0x1c2   : > { %v774_v63 = vmul.f32 %v1753_v11, %v758_v6  ;;  %v915_v51 = vsel %vm883_vm2, %v867_v47, %v899_v29  ;;  %v869_v55 = vsub.f32 1.0, %v853_v27  ;;  %v713_v8 = vmul.f32 %v1778_v38, %v697_v20 }
 0x1c3   : > { %v1822_v1 = vmul.f32 0.5, %v1707_v16  ;;  %v855_v9 = vmul.f32 %v1391_v45, %v775_v32  ;;  %v680_v11 = vmul.f32 %v1795_v0, %v664_v46  ;;  %v603_v13 = vadd.f32 1.0, %v587_v50  ;;  %v331_v16 = vld [vmem:[%s2047_s2 + $0x68] sm:$0xff] }
 0x1c4   : > { %v854_v3 = vmul.f32 %v1393_v31, %v774_v63  ;;  %v729_v7 = vadd.f32 -0.28449672, %v713_v8  ;;  %v1827_v26 = vmul.f32 0.5, %v1774_v10  ;;  %v795_v15 = vsub.f32 0.0, %v571_v17 }
 0x1c5   : > { %v1830_v61 = vadd.f32 %v1675_v48, %v328_v4  ;;  %v914_v47 = vsel %vm882_vm3, %v866_v52, %v898_v44  ;;  %v868_v29 = vsub.f32 1.0, %v852_v43  ;;  %v696_v27 = vadd.f32 1.4214138, %v680_v11  ;;  %v330_v48 = vld [vmem:[%s2047_s2 + $0x60] sm:$0xff] }
 0x1c6   : > { %1396 = vpow2.f32 %v832_v37  ;;  %v931_v34 = vadd.f32 1.0, %v915_v51  ;;  %v901_v42 = vsub.f32 0.0, %v869_v55  ;;  %v745_v10 = vmul.f32 %v1778_v38, %v729_v7 }
 0x1c7   : > { %1398 = vrcp.f32 %v603_v13  ;;  %v871_v52 = vsub.f32 1.0, %v855_v9  ;;  %v870_v6 = vsub.f32 1.0, %v854_v3  ;;  %v712_v41 = vmul.f32 %v1795_v0, %v696_v27 }
 0x1c8   : > { %v1848_v45 = vadd.f32 %v1685_v58, %v331_v16  ;;  %v930_v44 = vadd.f32 1.0, %v914_v47  ;;  %v761_v32 = vadd.f32 0.2548296, %v745_v10  ;;  %v811_v20 = vmul.f32 %v795_v15, %v571_v17 }
 0x1c9   : > { %v1851_v37 = vmul.f32 0.70710677, %v1830_v61  ;;  %v1395_v43 = vpop.eup %1394  ;;  %v900_v63 = vsub.f32 0.0, %v868_v29  ;;  %v728_v46 = vadd.f32 -0.28449672, %v712_v41  ;;  %v1854_v50 = vadd.f32 %v1691_v5, %v330_v48 }
 0x1ca   : > { %v1857_v4 = vadd.f32 %v1709_v18, %v333_v62  ;;  %v1860_v31 = vmul.f32 %v931_v34, %v1682_v54  ;;  %v917_v58 = vsel %vm885_vm4, %v869_v55, %v901_v42  ;;  %v777_v17 = vmul.f32 %v1778_v38, %v761_v32 }
 0x1cb   : > { %v570_v51 = vand.u32 2147483647, %v1851_v37  ;;  %v903_v8 = vsub.f32 0.0, %v871_v52  ;;  %v902_v9 = vsub.f32 0.0, %v870_v6  ;;  %v744_v3 = vmul.f32 %v1795_v0, %v728_v46 }
 0x1cc   : > { %v1868_v5 = vmul.f32 0.70710677, %v1848_v45  ;;  %v1871_v18 = vmul.f32 %v930_v44, %v1697_v57  ;;  %v857_v11 = vmul.f32 %v1395_v43, %v777_v17  ;;  %v838_v54 = vmul.f32 1.442695, %v811_v20 }
 0x1cd   : > { %v586_v19 = vmul.f32 0.3275911, %v570_v51  ;;  %v933_v55 = vadd.f32 1.0, %v917_v58  ;;  %v916_v38 = vsel %vm884_vm5, %v868_v29, %v900_v63  ;;  %v760_v13 = vadd.f32 0.2548296, %v744_v3  ;;  %v332_v58 = vld [vmem:[%s2047_s2 + $0x70] sm:$0xff] }
 0x1ce   : > { %v573_v7 = vand.u32 2147483647, %v1868_v5  ;;  %v873_v15 = vsub.f32 1.0, %v857_v11  ;;  %v794_v47 = vsub.f32 0.0, %v570_v51  ;;  %v1879_v57 = vmul.f32 0.70710677, %v1854_v50 }
 0x1cf   : > { %v602_v16 = vadd.f32 1.0, %v586_v19  ;;  %v919_v34 = vsel %vm887_vm6, %v871_v52, %v903_v8  ;;  %v918_v42 = vsel %vm886_vm7, %v870_v6, %v902_v9  ;;  %v776_v22 = vmul.f32 %v1795_v0, %v760_v13 }
 0x1d0   : > { %v1397_v27 = vpop.eup %1396  ;;  %v589_v29 = vmul.f32 0.3275911, %v573_v7  ;;  %v797_v48 = vsub.f32 0.0, %v573_v7  ;;  %v572_v62 = vand.u32 2147483647, %v1879_v57  ;;  %v905_v44 = vsub.f32 0.0, %v873_v15 }
 0x1d1   : > { %v1886_v10 = vpop.eup %1398  ;;  %1400 = vrcp.f32 %v602_v16  ;;  %v1890_v41 = vmul.f32 0.70710677, %v1857_v4  ;;  %v856_v32 = vmul.f32 %v1397_v27, %v776_v22  ;;  %v932_v20 = vadd.f32 1.0, %v916_v38 }
 0x1d2   : > { %v651_v35 = vmul.f32 1.0614054, %v1886_v10  ;;  %v605_v52 = vadd.f32 1.0, %v589_v29  ;;  %v935_v39 = vadd.f32 1.0, %v919_v34  ;;  %v810_v6 = vmul.f32 %v794_v47, %v570_v51 }
 0x1d3   : > { %v588_v43 = vmul.f32 0.3275911, %v572_v62  ;;  %v949_v0 = vmul.f32 %v933_v55, %v1713_v21  ;;  %v872_v63 = vsub.f32 1.0, %v856_v32  ;;  %v934_v17 = vadd.f32 1.0, %v918_v42 }
 0x1d4   : > { %v667_v46 = vadd.f32 -1.4531521, %v651_v35  ;;  %1402 = vrcp.f32 %v605_v52  ;;  %v813_v8 = vmul.f32 %v797_v48, %v573_v7  ;;  %v921_v3 = vsel %vm889_vm8, %v873_v15, %v905_v44 }
 0x1d5   : > { %1404 = vpow2.f32 %v838_v54  ;;  %v604_v9 = vadd.f32 1.0, %v588_v43  ;;  %v904_v11 = vsub.f32 0.0, %v872_v63  ;;  %v575_v19 = vand.u32 2147483647, %v1890_v41 }
 0x1d6   : > { %v683_v51 = vmul.f32 %v1886_v10, %v667_v46  ;;  %v948_v21 = vmul.f32 %v932_v20, %v1725_v30  ;;  %v951_v55 = vmul.f32 %v935_v39, %v1792_v49  ;;  %v836_v38 = vmul.f32 1.442695, %v810_v6 }
 0x1d7   : > { %v1904_v13 = vadd.f32 %v1719_v25, %v332_v58  ;;  %v920_v54 = vsel %vm888_vm9, %v872_v63, %v904_v11  ;;  %1406 = vrcp.f32 %v604_v9  ;;  %v591_v14 = vmul.f32 0.3275911, %v575_v19 }
 0x1d8   : > { %v699_v7 = vadd.f32 1.4214138, %v683_v51  ;;  %v950_v15 = vmul.f32 %v934_v17, %v1803_v60  ;;  %v937_v16 = vadd.f32 1.0, %v921_v3  ;;  %v842_v47 = vmul.f32 1.442695, %v813_v8 }
 0x1d9   : > { %v796_v27 = vsub.f32 0.0, %v572_v62  ;;  %v607_v30 = vadd.f32 1.0, %v591_v14  ;;  %v1911_v49 = vmul.f32 0.70710677, %v1904_v13  ;;  %v640_v25 = vmul.f32 1.0614054, %v1730_v12 }
 0x1da   : > { %v715_v34 = vmul.f32 %v1886_v10, %v699_v7  ;;  %v936_v33 = vadd.f32 1.0, %v920_v54  ;;  %1408 = vpow2.f32 %v836_v38  ;;  %v641_v22 = vmul.f32 1.0614054, %v1721_v28 }
 0x1db   : > { %v1914_v42 = vpop.eup %1400  ;;  %v1919_v60 = vpack.c.bf16 %v1860_v31, %v1871_v18  ;;  %1410 = vrcp.f32 %v607_v30  ;;  %v574_v44 = vand.u32 2147483647, %v1911_v49  ;;  %v953_v32 = vmul.f32 %v937_v16, %v1809_v40 }
 0x1dc   : > { %v731_v29 = vadd.f32 -0.28449672, %v715_v34  ;;  %v650_v48 = vmul.f32 1.0614054, %v1914_v42  ;;  %v812_v35 = vmul.f32 %v796_v27, %v572_v62  ;;  %v656_v52 = vadd.f32 -1.4531521, %v640_v25 }
 0x1dd   : > { %v1924_v20 = vpack.c.bf16 %v949_v0, %v948_v21  ;;  %1412 = vpow2.f32 %v842_v47  ;;  %v590_v31 = vmul.f32 0.3275911, %v574_v44  ;;  %v799_v46 = vsub.f32 0.0, %v575_v19 }
 0x1de   : > { %v1926_v39 = vpop.eup %1402  ;;  %v747_v6 = vmul.f32 %v1886_v10, %v731_v29  ;;  %v666_v43 = vadd.f32 -1.4531521, %v650_v48  ;;  %v657_v58 = vadd.f32 -1.4531521, %v641_v22  ;;  %v672_v17 = vmul.f32 %v1730_v12, %v656_v52 }
 0x1df   : > { %v1405_v18 = vpop.eup %1404  ;;  %v653_v63 = vmul.f32 1.0614054, %v1926_v39  ;;  %v952_v40 = vmul.f32 %v936_v33, %v1822_v1  ;;  %v606_v8 = vadd.f32 1.0, %v590_v31  ;;  %v1934_v51 = vpack.c.bf16 %v951_v55, %v950_v15 }
 0x1e0   : > { %v763_v62 = vadd.f32 0.2548296, %v747_v6  ;;  %v682_v0 = vmul.f32 %v1914_v42, %v666_v43  ;;  %v673_v3 = vmul.f32 %v1721_v28, %v657_v58  ;;  %v688_v11 = vadd.f32 1.4214138, %v672_v17 }
 0x1e1   : > { %v669_v9 = vadd.f32 -1.4531521, %v653_v63  ;;  %v1936_v21 = vpop.eup %1406  ;;  %1414 = vrcp.f32 %v606_v8  ;;  %v798_v7 = vsub.f32 0.0, %v574_v44  ;;  %vm891_vm10 = vcmp.ge.f32.partialorder %v1789_v24, 0.0 }
 0x1e2   : > { %v779_v38 = vmul.f32 %v1886_v10, %v763_v62  ;;  %v698_v54 = vadd.f32 1.4214138, %v682_v0  ;;  %v652_v14 = vmul.f32 1.0614054, %v1936_v21  ;;  %v689_v16 = vadd.f32 1.4214138, %v673_v3 }
 0x1e3   : > { %v685_v1 = vmul.f32 %v1926_v39, %v669_v9  ;;  %v704_v47 = vmul.f32 %v1730_v12, %v688_v11  ;;  %v815_v15 = vmul.f32 %v799_v46, %v575_v19  ;;  %v1944_v34 = vpack.c.bf16 %v953_v32, %v952_v40 }
 0x1e4   : > { %v859_v27 = vmul.f32 %v1405_v18, %v779_v38  ;;  %v714_v55 = vmul.f32 %v1914_v42, %v698_v54  ;;  %v1409_v30 = vpop.eup %1408  ;;  %v668_v25 = vadd.f32 -1.4531521, %v652_v14  ;;  %v705_v33 = vmul.f32 %v1721_v28, %v689_v16 }
 0x1e5   : > { %v701_v10 = vadd.f32 1.4214138, %v685_v1  ;;  %v720_v22 = vadd.f32 -0.28449672, %v704_v47  ;;  %v1947_v29 = vpop.eup %1410  ;;  %v840_v6 = vmul.f32 1.442695, %v812_v35  ;;  %v814_v43 = vmul.f32 %v798_v7, %v574_v44 }
 0x1e6   : > { %v875_v48 = vsub.f32 1.0, %v859_v27  ;;  %v730_v52 = vadd.f32 -0.28449672, %v714_v55  ;;  %v684_v18 = vmul.f32 %v1936_v21, %v668_v25  ;;  %v655_v19 = vmul.f32 1.0614054, %v1947_v29 }
 0x1e7   : > { %v717_v31 = vmul.f32 %v1926_v39, %v701_v10  ;;  %v721_v32 = vadd.f32 -0.28449672, %v705_v33  ;;  %v1413_v63 = vpop.eup %1412  ;;  %v846_v17 = vmul.f32 1.442695, %v815_v15  ;;  %v736_v40 = vmul.f32 %v1730_v12, %v720_v22 }
 0x1e8   : > { %v907_v46 = vsub.f32 0.0, %v875_v48  ;;  %v746_v58 = vmul.f32 %v1914_v42, %v730_v52  ;;  %v700_v0 = vadd.f32 1.4214138, %v684_v18  ;;  %v671_v8 = vadd.f32 -1.4531521, %v655_v19 }
 0x1e9   : > { %v733_v62 = vadd.f32 -0.28449672, %v717_v31  ;;  %v737_v35 = vmul.f32 %v1721_v28, %v721_v32  ;;  %v538_v44 = vmul.f32 0.5, %v1830_v61  ;;  %1416 = vpow2.f32 %v840_v6 }
 0x1ea   : > { %v762_v9 = vadd.f32 0.2548296, %v746_v58  ;;  %v752_v3 = vadd.f32 0.2548296, %v736_v40  ;;  %vm890_vm12 = vcmp.ge.f32.partialorder %v1851_v37, 0.0  ;;  %v716_v38 = vmul.f32 %v1936_v21, %v700_v0 }
 0x1eb   : > { %v749_v11 = vmul.f32 %v1926_v39, %v733_v62  ;;  %v687_v54 = vmul.f32 %v1947_v29, %v671_v8  ;;  %v844_v7 = vmul.f32 1.442695, %v814_v43  ;;  %v1961_v1 = vpop.eup %1414  ;;  %v923_v14 = vsel %vm891_vm10, %v875_v48, %v907_v46 }
 0x1ec   : > { %v778_v61 = vmul.f32 %v1914_v42, %v762_v9  ;;  %v753_v16 = vadd.f32 0.2548296, %v737_v35  ;;  %v768_v47 = vmul.f32 %v1730_v12, %v752_v3  ;;  %v732_v55 = vadd.f32 -0.28449672, %v716_v38 }
 0x1ed   : > { %v765_v27 = vadd.f32 0.2548296, %v749_v11  ;;  %v703_v15 = vadd.f32 1.4214138, %v687_v54  ;;  %1418 = vpow2.f32 %v846_v17  ;;  %v654_v25 = vmul.f32 1.0614054, %v1961_v1 }
 0x1ee   : > { %v858_v10 = vmul.f32 %v1409_v30, %v778_v61  ;;  %v769_v33 = vmul.f32 %v1721_v28, %v753_v16  ;;  %v848_v22 = vmul.f32 %v1758_v23, %v768_v47  ;;  %v939_v24 = vadd.f32 1.0, %v923_v14 }
 0x1ef   : > { %v781_v48 = vmul.f32 %v1926_v39, %v765_v27  ;;  %v748_v42 = vmul.f32 %v1936_v21, %v732_v55  ;;  %v719_v12 = vmul.f32 %v1947_v29, %v703_v15  ;;  %v670_v6 = vadd.f32 -1.4531521, %v654_v25 }
 0x1f0   : > { %v874_v52 = vsub.f32 1.0, %v858_v10  ;;  %v849_v43 = vmul.f32 %v1748_v2, %v769_v33  ;;  %v864_v31 = vsub.f32 1.0, %v848_v22  ;;  %1420 = vpow2.f32 %v844_v7 }
 0x1f1   : > { %v861_v18 = vmul.f32 %v1413_v63, %v781_v48  ;;  %v764_v30 = vadd.f32 0.2548296, %v748_v42  ;;  %v735_v19 = vadd.f32 -0.28449672, %v719_v12  ;;  %v686_v28 = vmul.f32 %v1961_v1, %v670_v6 }
 0x1f2   : > { %v906_v32 = vsub.f32 0.0, %v874_v52  ;;  %v865_v23 = vsub.f32 1.0, %v849_v43  ;;  %v896_v46 = vsub.f32 0.0, %v864_v31  ;;  %v955_v39 = vmul.f32 %v939_v24, %v1827_v26 }
 0x1f3   : > { %v877_v58 = vsub.f32 1.0, %v861_v18  ;;  %v780_v17 = vmul.f32 %v1936_v21, %v764_v30  ;;  %v751_v40 = vmul.f32 %v1947_v29, %v735_v19  ;;  %v1417_v62 = vpop.eup %1416  ;;  %v702_v63 = vadd.f32 1.4214138, %v686_v28 }
 0x1f4   : > { %v922_v2 = vsel %vm890_vm12, %v874_v52, %v906_v32  ;;  %v897_v0 = vsub.f32 0.0, %v865_v23  ;;  %v912_v8 = vsel %vm880_vm11, %v864_v31, %v896_v46  ;;  %vm893_vm14 = vcmp.ge.f32.partialorder %v1868_v5, 0.0 }
 0x1f5   : > { %v938_v35 = vadd.f32 1.0, %v922_v2  ;;  %v909_v9 = vsub.f32 0.0, %v877_v58  ;;  %v860_v3 = vmul.f32 %v1417_v62, %v780_v17  ;;  %v767_v11 = vadd.f32 0.2548296, %v751_v40  ;;  %v966_v17 = vld [vmem:[%s2049_s4 + $0x10] sm:$0xff] }
 0x1f6   : > { %v718_v26 = vmul.f32 %v1961_v1, %v702_v63  ;;  %v913_v21 = vsel %vm881_vm13, %v865_v23, %v897_v0  ;;  %v928_v38 = vadd.f32 1.0, %v912_v8  ;;  %v541_v10 = vmul.f32 0.5, %v1848_v45 }
 0x1f7   : > { %v1419_v54 = vpop.eup %1418  ;;  %v954_v37 = vmul.f32 %v938_v35, %v538_v44  ;;  %v925_v7 = vsel %vm893_vm14, %v877_v58, %v909_v9  ;;  %v876_v14 = vsub.f32 1.0, %v860_v3  ;;  %v783_v61 = vmul.f32 %v1947_v29, %v767_v11 }
 0x1f8   : > { %v941_v59 = vadd.f32 1.0, %v925_v7  ;;  %v734_v16 = vadd.f32 -0.28449672, %v718_v26  ;;  %v929_v47 = vadd.f32 1.0, %v913_v21  ;;  %v944_v27 = vmul.f32 %v928_v38, %v1679_v53 }
 0x1f9   : > { %v908_v55 = vsub.f32 0.0, %v876_v14  ;;  %v863_v15 = vmul.f32 %v1419_v54, %v783_v61  ;;  %v1321_v5 = vpack.c.bf16 %v955_v39, %v954_v37  ;;  %vm892_vm15 = vcmp.ge.f32.partialorder %v1879_v57, 0.0  ;;  %v967_v39 = vld [vmem:[%s2049_s4 + $0x18] sm:$0xff] }
 0x1fa   : > { %v750_v56 = vmul.f32 %v1961_v1, %v734_v16  ;;  %v945_v44 = vmul.f32 %v929_v47, %v1658_v36  ;;  %v1421_v25 = vpop.eup %1420  ;;  %v540_v33 = vmul.f32 0.5, %v1854_v50  ;;  %v957_v24 = vmul.f32 %v941_v59, %v541_v10 }
 0x1fb   : > { %v924_v29 = vsel %vm892_vm15, %v876_v14, %v908_v55  ;;  %v879_v22 = vsub.f32 1.0, %v863_v15  ;;  %vm895_vm1 = vcmp.ge.f32.partialorder %v1890_v41, 0.0  ;;  %v543_v18 = vmul.f32 0.5, %v1857_v4  ;;  %v961_v4 = vld [vmem:[%s2048_s3 + $0x8] sm:$0xff] }
 0x1fc   : > { %v940_v48 = vadd.f32 1.0, %v924_v29  ;;  %v766_v42 = vadd.f32 0.2548296, %v750_v56  ;;  %v1301_v53 = vpack.c.bf16 %v945_v44, %v944_v27  ;;  %vm894_vm2 = vcmp.ge.f32.partialorder %v1911_v49, 0.0  ;;  %v963_v49 = vld [vmem:[%s2048_s3 + $0x18] sm:$0xff] }
 0x1fd   : > { %v911_v12 = vsub.f32 0.0, %v879_v22  ;;  %v542_v41 = vmul.f32 0.5, %v1904_v13  ;;  %v962_v13 = vld [vmem:[%s2048_s3 + $0x10] sm:$0xff] }
 0x1fe   : > { %v956_v52 = vmul.f32 %v940_v48, %v540_v33  ;;  %v782_v6 = vmul.f32 %v1961_v1, %v766_v42  ;;  %1302 = vmatprep.subr.bf16.mxu1 %v1301_v53 }
 0x1ff   : > { %1304 = vmatpush3.bf16.msra.mxu1 %v1301_v53  ;;  %v927_v45 = vsel %vm895_vm1, %v879_v22, %v911_v12 }
 0x200   : > { %v862_v57 = vmul.f32 %v1421_v25, %v782_v6  ;;  %1306 = vmatprep.subr.bf16.mxu1 %v1919_v60  ;;  %v1325_v36 = vpack.c.bf16 %v957_v24, %v956_v52  ;;  %v943_v43 = vadd.f32 1.0, %v927_v45 }
 0x202   : > { %v878_v50 = vsub.f32 1.0, %v862_v57  ;;  %v959_v30 = vmul.f32 %v943_v43, %v543_v18 }
 0x203   : > { %1308 = vmatpush3.bf16.msra.mxu1 %v1919_v60 }
 0x204   : > { %v910_v31 = vsub.f32 0.0, %v878_v50  ;;  %1310 = vmatprep.subr.bf16.mxu1 %v1924_v20 }
 0x206   : > { %v926_v1 = vsel %vm894_vm2, %v878_v50, %v910_v31 }
 0x207   : > { %v942_v19 = vadd.f32 1.0, %v926_v1  ;;  %1312 = vmatpush3.bf16.msra.mxu1 %v1924_v20  ;;  %v965_v20 = vld [vmem:[%s2049_s4 + $0x8] sm:$0xff] }
 0x208   : > { %1314 = vmatprep.subr.bf16.mxu1 %v1934_v51 }
 0x209   : > { %v958_v32 = vmul.f32 %v942_v19, %v542_v41 }
 0x20b   : > { %1316 = vmatpush3.bf16.msra.mxu1 %v1934_v51  ;;  %v1329_v60 = vpack.c.bf16 %v959_v30, %v958_v32  ;;  %v964_v51 = vld [vmem:[%s2049_s4] sm:$0xff] }
 0x20c   : > { %1318 = vmatprep.subr.bf16.mxu1 %v1944_v34 }
 0x20f   : > { %1320 = vmatpush3.bf16.msra.mxu1 %v1944_v34 }
 0x210   : > { %1322 = vmatprep.subr.bf16.mxu1 %v1321_v5 }
 0x213   : > { %1324 = vmatpush3.bf16.msra.mxu1 %v1321_v5 }
 0x214   : > { %1326 = vmatprep.subr.bf16.mxu1 %v1325_v36 }
 0x217   : > { %1328 = vmatpush3.bf16.msra.mxu1 %v1325_v36 }
 0x218   : > { %1330 = vmatprep.subr.bf16.mxu1 %v1329_v60 }
 0x21b   : > { %1332 = vmatpush3.bf16.msra.mxu1 %v1329_v60 }
 0x21e   : > { %1288 = vmatmul.mubr.f32.vlgmr.msra.gmra.mrb[0].mxu1 %v961_v4 }
 0x21f   : > { %1290 = vmatprep.mubr.f32.mxu1 %v962_v13 }
 0x222   : > { %1291 = vmatmul.mubr.f32.gmra.mrb[2].mxu1 %v963_v49 }
 0x2f1   : > { %v1289_v34 = vpop.f32.mrb[0].mxu1 }
 0x2f2   : > { %v1040_v28 = vadd.f32 %v1289_v34, %v965_v20  ;;  %v1034_v23 = vpop.f32.mrb[1].mxu1 }
 0x2f3   : > { %v1035_v46 = vadd.f32 %v1034_v23, %v964_v51 }
 0x2f4   : > { %v1176_v58 = vmul.f32 -1.442695, %v1040_v28 }
 0x2f5   : > { %v1175_v40 = vmul.f32 -1.442695, %v1035_v46  ;;  %v1292_v62 = vpop.f32.mrb[2].mxu1 }
 0x2f6   : > { %1422 = vpow2.f32 %v1176_v58  ;;  %v1050_v2 = vadd.f32 %v1292_v62, %v967_v39  ;;  %v1044_v63 = vpop.f32.mrb[3].mxu1 }
 0x2f7   : > { %1424 = vpow2.f32 %v1175_v40  ;;  %v1045_v0 = vadd.f32 %v1044_v63, %v966_v17 }
 0x2f8   : > { %v1178_v8 = vmul.f32 -1.442695, %v1050_v2 }
 0x2f9   : > { %v1177_v35 = vmul.f32 -1.442695, %v1045_v0 }
 0x2fa   : > { %1426 = vpow2.f32 %v1178_v8 }
 0x2fb   : > { %1428 = vpow2.f32 %v1177_v35 }
 0x300   : > { %v1423_v9 = vpop.eup %1422 }
 0x301   : > { %v1425_v3 = vpop.eup %1424  ;;  %v1066_v11 = vadd.f32 1.0, %v1423_v9 }
 0x302   : > { %v1065_v26 = vadd.f32 1.0, %v1425_v3 }
 0x303   : > { %1430 = vrcp.f32 %v1066_v11 }
 0x304   : > { %v1427_v21 = vpop.eup %1426  ;;  %1432 = vrcp.f32 %v1065_v26 }
 0x305   : > { %v1429_v38 = vpop.eup %1428  ;;  %v1068_v54 = vadd.f32 1.0, %v1427_v21 }
 0x306   : > { %v1067_v37 = vadd.f32 1.0, %v1429_v38 }
 0x307   : > { %1434 = vrcp.f32 %v1068_v54 }
 0x308   : > { %1436 = vrcp.f32 %v1067_v37 }
 0x30d   : > { %v1431_v7 = vpop.eup %1430 }
 0x30e   : > { %v1433_v14 = vpop.eup %1432  ;;  %1078 = vst.msk [vmem:[%s252_s25 + $0x8] sm:$0xff] %vm257_vm0, %v1431_v7 }
 0x30f   : > { %1077 = vst.msk [vmem:[%s252_s25] sm:$0xff] %vm257_vm0, %v1433_v14 }
 0x311   : > { %v1435_v61 = vpop.eup %1434 }
 0x312   : > { %v1437_v59 = vpop.eup %1436  ;;  %1080 = vst.msk [vmem:[%s252_s25 + $0x18] sm:$0xff] %vm257_vm0, %v1435_v61 }
 0x313   : > { %1079 = vst.msk [vmem:[%s252_s25 + $0x10] sm:$0xff] %vm257_vm0, %v1437_v59 }
 0x314 PF: > { %s15_s20 = sadd.s32 1, %s1460_s20   ;;  %s2051_s18 = smov %s1456_s19 }
 0x315   : > { %p12_p5 = scmp.ge.s32.totalorder %s15_s20, 4   ;;  %s2052_s19 = smov %s2054_s21 }
 0x317   :  { %14 = sbr.rel (!%p12_p5) target bundleno = 2 (0x2), region = 78 }

</bundles_post_ra>
